<compile_context>
chip_gen: v5e
topology: v5e:2x2
jax: 0.10.0
libtpu: 0.0.40
codegen_flags: <defaults>
</compile_context>

<pallas_src>
import math

import jax
import jax.numpy as jnp
from jax.experimental import pallas as pl
from jax.experimental.pallas import tpu as pltpu

# ---- module hyperparameters (consistent with the PyTorch module) ----
N_EMBED = 32
NUM_HEADS = 4
HEAD_SIZE = N_EMBED // NUM_HEADS  # 8
BLOCK_SIZE = 8                    # max sequence length (tril buffer size)
DROPOUT = 0.1
# TODO(synk): Dropout is stochastic training-time behavior; implemented as
# identity (eval mode), matching module.eval() semantics.


def make_mha_kernel(B, T, H, hs, C):
    """Fused multi-head causal attention + output projection (one grid step)."""
    scale = C ** -0.5          # NOTE: module scales by embed dim C, not head_size
    HH = H * hs

    def kernel(x_ref, wqkv_ref, wproj_ref, bproj_ref, o_ref):
        # x_ref: (B*T, C)  wqkv_ref: (C, 3*H*hs)  wproj_ref: (C, C)
        # bproj_ref: (1, C)  o_ref: (B*T, C)
        x = x_ref[...]

        # One MXU matmul produces Q, K, V for every head of every token.
        qkv = jnp.dot(x, wqkv_ref[...], preferred_element_type=jnp.float32)

        # Additive causal mask; finite large-negative so exp() underflows to 0
        # (NaN-safe even if a row were ever fully masked).
        row = jax.lax.broadcasted_iota(jnp.int32, (T, T), 0)
        col = jax.lax.broadcasted_iota(jnp.int32, (T, T), 1)
        mask_add = jnp.where(col <= row, 0.0, -1e30).astype(jnp.float32)
        mask_add = mask_add[None, :, :]                          # (1, T, T)

        head_outs = []
        for h in range(H):  # statically unrolled (H = 4), all data in vregs
            qh = qkv[:, h * hs:(h + 1) * hs].reshape(B, T, hs)
            kh = qkv[:, HH + h * hs:HH + (h + 1) * hs].reshape(B, T, hs)
            vh = qkv[:, 2 * HH + h * hs:2 * HH + (h + 1) * hs].reshape(B, T, hs)

            # q·kᵀ batched over B, contracting last dims (no explicit .T).
            s = jnp.einsum('btd,bsd->bts', qh, kh,
                           preferred_element_type=jnp.float32) * scale
            s = s + mask_add

            # Softmax; row-max subtraction skipped (diagonal always finite,
            # scores tiny at these shapes). Approx reciprocal -> EUP slot.
            p = jnp.exp(s)
            p = p * pl.reciprocal(jnp.sum(p, axis=-1, keepdims=True),
                                  approx=True)

            oh = jnp.einsum('bts,bsd->btd', p, vh,
                            preferred_element_type=jnp.float32)  # (B, T, hs)
            head_outs.append(oh.reshape(B * T, hs))

        # "Concat heads" -> dense (B*T, C) slab, then fused output projection.
        # (Dropout before proj is identity in eval mode.)
        y = jnp.concatenate(head_outs, axis=-1)                  # (B*T, C)
        out = jnp.dot(y, wproj_ref[...], preferred_element_type=jnp.float32)
        out = out + bproj_ref[...]
        o_ref[...] = out.astype(o_ref.dtype)

    return kernel


def multi_head_attention(x, wq, wk, wv, w_proj, b_proj):
    """
    x:        (B, T, C)
    wq/wk/wv: (H, C, hs)  per-head projection weights (forward is x @ W[h])
    w_proj:   (C, C)      out = y @ w_proj + b_proj
    b_proj:   (C,)
    """
    B, T, C = x.shape
    H, _, hs = wq.shape

    # One-time layout plumbing (outside the kernel): pack per-head weights into
    # a single (C, 3*H*hs) matrix; column block h of each third equals W[h].
    wq2 = jnp.transpose(wq, (1, 0, 2)).reshape(C, H * hs)
    wk2 = jnp.transpose(wk, (1, 0, 2)).reshape(C, H * hs)
    wv2 = jnp.transpose(wv, (1, 0, 2)).reshape(C, H * hs)
    w_qkv = jnp.concatenate([wq2, wk2, wv2], axis=-1)            # (C, 3*H*hs)

    x2d = x.reshape(B * T, C)                                    # free reshape

    out2d = pl.pallas_call(
        make_mha_kernel(B, T, H, hs, C),
        out_shape=jax.ShapeDtypeStruct((B * T, C), x.dtype),
        grid_spec=pltpu.PrefetchScalarGridSpec(
            num_scalar_prefetch=0,
            grid=(1,),
            in_specs=[
                pl.BlockSpec((B * T, C), lambda i: (0, 0)),
                pl.BlockSpec((C, 3 * H * hs), lambda i: (0, 0)),
                pl.BlockSpec((C, C), lambda i: (0, 0)),
                pl.BlockSpec((1, C), lambda i: (0, 0)),
            ],
            out_specs=pl.BlockSpec((B * T, C), lambda i: (0, 0)),
        ),
        compiler_params=pltpu.CompilerParams(
            dimension_semantics=("arbitrary",)),
    )(x2d, w_qkv, w_proj, b_proj.reshape(1, C))

    return out2d.reshape(B, T, C)


def reference(x, wq, wk, wv, w_proj, b_proj):
    """Plain-JAX reference mirroring the PyTorch forward (eval mode)."""
    B, T, C = x.shape
    outs = []
    for h in range(wq.shape[0]):
        q = x @ wq[h]
        k = x @ wk[h]
        v = x @ wv[h]
        wei = (q @ jnp.swapaxes(k, -2, -1)) * (C ** -0.5)
        mask = jnp.tril(jnp.ones((T, T), dtype=bool))
        wei = jnp.where(mask, wei, -jnp.inf)
        wei = jax.nn.softmax(wei, axis=-1)
        outs.append(wei @ v)
    y = jnp.concatenate(outs, axis=-1)
    return y @ w_proj + b_proj


if __name__ == "__main__":
    key = jax.random.PRNGKey(0)
    kx, kq, kk, kv, kp, kb = jax.random.split(key, 6)

    B, T = 2, BLOCK_SIZE
    x = jax.random.normal(kx, (B, T, N_EMBED), dtype=jnp.float32)

    # Deterministic synthetic parameters (nn.Linear stores weight (out,in); we
    # use the (in,out)-transposed form so forward is x @ W).
    scale = 1.0 / math.sqrt(N_EMBED)
    wq = jax.random.uniform(kq, (NUM_HEADS, N_EMBED, HEAD_SIZE),
                            minval=-scale, maxval=scale, dtype=jnp.float32)
    wk = jax.random.uniform(kk, (NUM_HEADS, N_EMBED, HEAD_SIZE),
                            minval=-scale, maxval=scale, dtype=jnp.float32)
    wv = jax.random.uniform(kv, (NUM_HEADS, N_EMBED, HEAD_SIZE),
                            minval=-scale, maxval=scale, dtype=jnp.float32)
    w_proj = jax.random.uniform(kp, (N_EMBED, N_EMBED),
                                minval=-scale, maxval=scale, dtype=jnp.float32)
    b_proj = jax.random.uniform(kb, (N_EMBED,),
                                minval=-scale, maxval=scale, dtype=jnp.float32)

    out = multi_head_attention(x, wq, wk, wv, w_proj, b_proj)
    out = jax.block_until_ready(out)

    ref = reference(x, wq, wk, wv, w_proj, b_proj)
    assert out.shape == (B, T, N_EMBED)
    # Tolerance slightly looser than exact-softmax because the kernel uses the
    # EUP approximate reciprocal for the softmax denominator.
    assert jnp.allclose(out, ref, atol=2e-3, rtol=2e-3), "mismatch vs reference"

    print("KERNEL_OK")
</pallas_src>

<mosaic_0001>
module attributes {stable_mosaic.version = 11 : i64} {
  func.func @kernel(%arg0: i32, %arg1: memref<16x32xf32, #tpu.memory_space<vmem>>, %arg2: memref<32x96xf32, #tpu.memory_space<vmem>>, %arg3: memref<32x32xf32, #tpu.memory_space<vmem>>, %arg4: memref<1x32xf32, #tpu.memory_space<vmem>>, %arg5: memref<16x32xf32, #tpu.memory_space<vmem>>) attributes {dimension_semantics = [#tpu.dimension_semantics<arbitrary>], iteration_bounds = array<i64: 1>, scalar_prefetch = 0 : i64, scratch_operands = 0 : i64, tpu.core_type = #tpu.core_type<tc>, window_params = [{pipeline_mode = #tpu.pipeline_mode<synchronous>, transform_indices = @transform_0, window_bounds = array<i64: 16, 32>}, {pipeline_mode = #tpu.pipeline_mode<synchronous>, transform_indices = @transform_1, window_bounds = array<i64: 32, 96>}, {pipeline_mode = #tpu.pipeline_mode<synchronous>, transform_indices = @transform_2, window_bounds = array<i64: 32, 32>}, {pipeline_mode = #tpu.pipeline_mode<synchronous>, transform_indices = @transform_3, window_bounds = array<i64: 1, 32>}, {pipeline_mode = #tpu.pipeline_mode<synchronous>, transform_indices = @transform_4, window_bounds = array<i64: 16, 32>}]} {
    %c0 = arith.constant 0 : index
    %c0_0 = arith.constant 0 : index
    %0 = vector.load %arg1[%c0, %c0_0] : memref<16x32xf32, #tpu.memory_space<vmem>>, vector<16x32xf32>
    %c0_1 = arith.constant 0 : index
    %c0_2 = arith.constant 0 : index
    %1 = vector.load %arg2[%c0_1, %c0_2] : memref<32x96xf32, #tpu.memory_space<vmem>>, vector<32x96xf32>
    %cst = arith.constant dense<0.000000e+00> : vector<16x96xf32>
    %2 = tpu.matmul %0, %1, %cst {dimension_numbers = #tpu.dot_dimension_numbers<[1], [0], [0], [1], [0, 0, 1, 1], [], []>} : vector<16x32xf32>, vector<32x96xf32>, vector<16x96xf32> -> vector<16x96xf32>
    %3 = tpu.iota {dimensions = array<i32: 0>} : vector<8x8xi32>
    %4 = tpu.iota {dimensions = array<i32: 1>} : vector<8x8xi32>
    %5 = arith.cmpi sle, %4, %3 : vector<8x8xi32>
    %cst_3 = arith.constant 0.000000e+00 : f32
    %cst_4 = arith.constant -1.000000e+30 : f32
    %6 = vector.broadcast %cst_3 : f32 to vector<8x8xf32>
    %7 = vector.broadcast %cst_4 : f32 to vector<8x8xf32>
    %8 = arith.select %5, %6, %7 : vector<8x8xi1>, vector<8x8xf32>
    %9 = vector.shape_cast %8 : vector<8x8xf32> to vector<1x8x8xf32>
    %10 = vector.extract_strided_slice %2 {offsets = [0, 0], sizes = [16, 8], strides = [1, 1]} : vector<16x96xf32> to vector<16x8xf32>
    %11 = vector.shape_cast %10 : vector<16x8xf32> to vector<2x8x8xf32>
    %12 = vector.extract_strided_slice %2 {offsets = [0, 32], sizes = [16, 8], strides = [1, 1]} : vector<16x96xf32> to vector<16x8xf32>
    %13 = vector.shape_cast %12 : vector<16x8xf32> to vector<2x8x8xf32>
    %14 = vector.extract_strided_slice %2 {offsets = [0, 64], sizes = [16, 8], strides = [1, 1]} : vector<16x96xf32> to vector<16x8xf32>
    %15 = vector.shape_cast %14 : vector<16x8xf32> to vector<2x8x8xf32>
    "tpu.trace_start"() <{level = 10 : i32, message = "btd,bsd->bts"}> : () -> ()
    %cst_5 = arith.constant dense<0.000000e+00> : vector<2x8x8xf32>
    %16 = tpu.matmul %11, %13, %cst_5 {dimension_numbers = #tpu.dot_dimension_numbers<[2], [2], [1], [1], [0, 0, 0, 1, 1, 1], [0], [0]>} : vector<2x8x8xf32>, vector<2x8x8xf32>, vector<2x8x8xf32> -> vector<2x8x8xf32>
    "tpu.trace_stop"() : () -> ()
    %cst_6 = arith.constant 0.176776692 : f32
    %17 = vector.broadcast %cst_6 : f32 to vector<2x8x8xf32>
    %18 = arith.mulf %16, %17 : vector<2x8x8xf32>
    %19 = vector.broadcast %9 : vector<1x8x8xf32> to vector<2x8x8xf32>
    %20 = arith.addf %18, %19 : vector<2x8x8xf32>
    %21 = math.exp %20 : vector<2x8x8xf32>
    %cst_7 = arith.constant dense<0.000000e+00> : vector<2x8xf32>
    %22 = vector.multi_reduction <add>, %21, %cst_7 [2] : vector<2x8x8xf32> to vector<2x8xf32>
    %23 = vector.shape_cast %22 : vector<2x8xf32> to vector<2x8x1xf32>
    %24 = tpu.reciprocal %23 {approx = true} : vector<2x8x1xf32> -> vector<2x8x1xf32>
    %25 = vector.broadcast %24 : vector<2x8x1xf32> to vector<2x8x8xf32>
    %26 = arith.mulf %21, %25 : vector<2x8x8xf32>
    "tpu.trace_start"() <{level = 10 : i32, message = "bts,bsd->btd"}> : () -> ()
    %cst_8 = arith.constant dense<0.000000e+00> : vector<2x8x8xf32>
    %27 = tpu.matmul %26, %15, %cst_8 {dimension_numbers = #tpu.dot_dimension_numbers<[2], [1], [1], [2], [0, 0, 0, 1, 1, 2], [0], [0]>} : vector<2x8x8xf32>, vector<2x8x8xf32>, vector<2x8x8xf32> -> vector<2x8x8xf32>
    "tpu.trace_stop"() : () -> ()
    %28 = vector.shape_cast %27 : vector<2x8x8xf32> to vector<16x8xf32>
    %29 = vector.extract_strided_slice %2 {offsets = [0, 8], sizes = [16, 8], strides = [1, 1]} : vector<16x96xf32> to vector<16x8xf32>
    %30 = vector.shape_cast %29 : vector<16x8xf32> to vector<2x8x8xf32>
    %31 = vector.extract_strided_slice %2 {offsets = [0, 40], sizes = [16, 8], strides = [1, 1]} : vector<16x96xf32> to vector<16x8xf32>
    %32 = vector.shape_cast %31 : vector<16x8xf32> to vector<2x8x8xf32>
    %33 = vector.extract_strided_slice %2 {offsets = [0, 72], sizes = [16, 8], strides = [1, 1]} : vector<16x96xf32> to vector<16x8xf32>
    %34 = vector.shape_cast %33 : vector<16x8xf32> to vector<2x8x8xf32>
    "tpu.trace_start"() <{level = 10 : i32, message = "btd,bsd->bts"}> : () -> ()
    %cst_9 = arith.constant dense<0.000000e+00> : vector<2x8x8xf32>
    %35 = tpu.matmul %30, %32, %cst_9 {dimension_numbers = #tpu.dot_dimension_numbers<[2], [2], [1], [1], [0, 0, 0, 1, 1, 1], [0], [0]>} : vector<2x8x8xf32>, vector<2x8x8xf32>, vector<2x8x8xf32> -> vector<2x8x8xf32>
    "tpu.trace_stop"() : () -> ()
    %cst_10 = arith.constant 0.176776692 : f32
    %36 = vector.broadcast %cst_10 : f32 to vector<2x8x8xf32>
    %37 = arith.mulf %35, %36 : vector<2x8x8xf32>
    %38 = vector.broadcast %9 : vector<1x8x8xf32> to vector<2x8x8xf32>
    %39 = arith.addf %37, %38 : vector<2x8x8xf32>
    %40 = math.exp %39 : vector<2x8x8xf32>
    %cst_11 = arith.constant dense<0.000000e+00> : vector<2x8xf32>
    %41 = vector.multi_reduction <add>, %40, %cst_11 [2] : vector<2x8x8xf32> to vector<2x8xf32>
    %42 = vector.shape_cast %41 : vector<2x8xf32> to vector<2x8x1xf32>
    %43 = tpu.reciprocal %42 {approx = true} : vector<2x8x1xf32> -> vector<2x8x1xf32>
    %44 = vector.broadcast %43 : vector<2x8x1xf32> to vector<2x8x8xf32>
    %45 = arith.mulf %40, %44 : vector<2x8x8xf32>
    "tpu.trace_start"() <{level = 10 : i32, message = "bts,bsd->btd"}> : () -> ()
    %cst_12 = arith.constant dense<0.000000e+00> : vector<2x8x8xf32>
    %46 = tpu.matmul %45, %34, %cst_12 {dimension_numbers = #tpu.dot_dimension_numbers<[2], [1], [1], [2], [0, 0, 0, 1, 1, 2], [0], [0]>} : vector<2x8x8xf32>, vector<2x8x8xf32>, vector<2x8x8xf32> -> vector<2x8x8xf32>
    "tpu.trace_stop"() : () -> ()
    %47 = vector.shape_cast %46 : vector<2x8x8xf32> to vector<16x8xf32>
    %48 = vector.extract_strided_slice %2 {offsets = [0, 16], sizes = [16, 8], strides = [1, 1]} : vector<16x96xf32> to vector<16x8xf32>
    %49 = vector.shape_cast %48 : vector<16x8xf32> to vector<2x8x8xf32>
    %50 = vector.extract_strided_slice %2 {offsets = [0, 48], sizes = [16, 8], strides = [1, 1]} : vector<16x96xf32> to vector<16x8xf32>
    %51 = vector.shape_cast %50 : vector<16x8xf32> to vector<2x8x8xf32>
    %52 = vector.extract_strided_slice %2 {offsets = [0, 80], sizes = [16, 8], strides = [1, 1]} : vector<16x96xf32> to vector<16x8xf32>
    %53 = vector.shape_cast %52 : vector<16x8xf32> to vector<2x8x8xf32>
    "tpu.trace_start"() <{level = 10 : i32, message = "btd,bsd->bts"}> : () -> ()
    %cst_13 = arith.constant dense<0.000000e+00> : vector<2x8x8xf32>
    %54 = tpu.matmul %49, %51, %cst_13 {dimension_numbers = #tpu.dot_dimension_numbers<[2], [2], [1], [1], [0, 0, 0, 1, 1, 1], [0], [0]>} : vector<2x8x8xf32>, vector<2x8x8xf32>, vector<2x8x8xf32> -> vector<2x8x8xf32>
    "tpu.trace_stop"() : () -> ()
    %cst_14 = arith.constant 0.176776692 : f32
    %55 = vector.broadcast %cst_14 : f32 to vector<2x8x8xf32>
    %56 = arith.mulf %54, %55 : vector<2x8x8xf32>
    %57 = vector.broadcast %9 : vector<1x8x8xf32> to vector<2x8x8xf32>
    %58 = arith.addf %56, %57 : vector<2x8x8xf32>
    %59 = math.exp %58 : vector<2x8x8xf32>
    %cst_15 = arith.constant dense<0.000000e+00> : vector<2x8xf32>
    %60 = vector.multi_reduction <add>, %59, %cst_15 [2] : vector<2x8x8xf32> to vector<2x8xf32>
    %61 = vector.shape_cast %60 : vector<2x8xf32> to vector<2x8x1xf32>
    %62 = tpu.reciprocal %61 {approx = true} : vector<2x8x1xf32> -> vector<2x8x1xf32>
    %63 = vector.broadcast %62 : vector<2x8x1xf32> to vector<2x8x8xf32>
    %64 = arith.mulf %59, %63 : vector<2x8x8xf32>
    "tpu.trace_start"() <{level = 10 : i32, message = "bts,bsd->btd"}> : () -> ()
    %cst_16 = arith.constant dense<0.000000e+00> : vector<2x8x8xf32>
    %65 = tpu.matmul %64, %53, %cst_16 {dimension_numbers = #tpu.dot_dimension_numbers<[2], [1], [1], [2], [0, 0, 0, 1, 1, 2], [0], [0]>} : vector<2x8x8xf32>, vector<2x8x8xf32>, vector<2x8x8xf32> -> vector<2x8x8xf32>
    "tpu.trace_stop"() : () -> ()
    %66 = vector.shape_cast %65 : vector<2x8x8xf32> to vector<16x8xf32>
    %67 = vector.extract_strided_slice %2 {offsets = [0, 24], sizes = [16, 8], strides = [1, 1]} : vector<16x96xf32> to vector<16x8xf32>
    %68 = vector.shape_cast %67 : vector<16x8xf32> to vector<2x8x8xf32>
    %69 = vector.extract_strided_slice %2 {offsets = [0, 56], sizes = [16, 8], strides = [1, 1]} : vector<16x96xf32> to vector<16x8xf32>
    %70 = vector.shape_cast %69 : vector<16x8xf32> to vector<2x8x8xf32>
    %71 = vector.extract_strided_slice %2 {offsets = [0, 88], sizes = [16, 8], strides = [1, 1]} : vector<16x96xf32> to vector<16x8xf32>
    %72 = vector.shape_cast %71 : vector<16x8xf32> to vector<2x8x8xf32>
    "tpu.trace_start"() <{level = 10 : i32, message = "btd,bsd->bts"}> : () -> ()
    %cst_17 = arith.constant dense<0.000000e+00> : vector<2x8x8xf32>
    %73 = tpu.matmul %68, %70, %cst_17 {dimension_numbers = #tpu.dot_dimension_numbers<[2], [2], [1], [1], [0, 0, 0, 1, 1, 1], [0], [0]>} : vector<2x8x8xf32>, vector<2x8x8xf32>, vector<2x8x8xf32> -> vector<2x8x8xf32>
    "tpu.trace_stop"() : () -> ()
    %cst_18 = arith.constant 0.176776692 : f32
    %74 = vector.broadcast %cst_18 : f32 to vector<2x8x8xf32>
    %75 = arith.mulf %73, %74 : vector<2x8x8xf32>
    %76 = vector.broadcast %9 : vector<1x8x8xf32> to vector<2x8x8xf32>
    %77 = arith.addf %75, %76 : vector<2x8x8xf32>
    %78 = math.exp %77 : vector<2x8x8xf32>
    %cst_19 = arith.constant dense<0.000000e+00> : vector<2x8xf32>
    %79 = vector.multi_reduction <add>, %78, %cst_19 [2] : vector<2x8x8xf32> to vector<2x8xf32>
    %80 = vector.shape_cast %79 : vector<2x8xf32> to vector<2x8x1xf32>
    %81 = tpu.reciprocal %80 {approx = true} : vector<2x8x1xf32> -> vector<2x8x1xf32>
    %82 = vector.broadcast %81 : vector<2x8x1xf32> to vector<2x8x8xf32>
    %83 = arith.mulf %78, %82 : vector<2x8x8xf32>
    "tpu.trace_start"() <{level = 10 : i32, message = "bts,bsd->btd"}> : () -> ()
    %cst_20 = arith.constant dense<0.000000e+00> : vector<2x8x8xf32>
    %84 = tpu.matmul %83, %72, %cst_20 {dimension_numbers = #tpu.dot_dimension_numbers<[2], [1], [1], [2], [0, 0, 0, 1, 1, 2], [0], [0]>} : vector<2x8x8xf32>, vector<2x8x8xf32>, vector<2x8x8xf32> -> vector<2x8x8xf32>
    "tpu.trace_stop"() : () -> ()
    %85 = vector.shape_cast %84 : vector<2x8x8xf32> to vector<16x8xf32>
    %86 = tpu.concatenate %28, %47, %66, %85 in 1 : vector<16x8xf32>, vector<16x8xf32>, vector<16x8xf32>, vector<16x8xf32> -> vector<16x32xf32>
    %c0_21 = arith.constant 0 : index
    %c0_22 = arith.constant 0 : index
    %87 = vector.load %arg3[%c0_21, %c0_22] : memref<32x32xf32, #tpu.memory_space<vmem>>, vector<32x32xf32>
    %cst_23 = arith.constant dense<0.000000e+00> : vector<16x32xf32>
    %88 = tpu.matmul %86, %87, %cst_23 {dimension_numbers = #tpu.dot_dimension_numbers<[1], [0], [0], [1], [0, 0, 1, 1], [], []>} : vector<16x32xf32>, vector<32x32xf32>, vector<16x32xf32> -> vector<16x32xf32>
    %c0_24 = arith.constant 0 : index
    %c0_25 = arith.constant 0 : index
    %89 = vector.load %arg4[%c0_24, %c0_25] : memref<1x32xf32, #tpu.memory_space<vmem>>, vector<1x32xf32>
    %90 = vector.broadcast %89 : vector<1x32xf32> to vector<16x32xf32>
    %91 = arith.addf %88, %90 : vector<16x32xf32>
    %c0_26 = arith.constant 0 : index
    %c0_27 = arith.constant 0 : index
    %92 = vector.load %arg5[%c0_26, %c0_27] : memref<16x32xf32, #tpu.memory_space<vmem>>, vector<16x32xf32>
    tpu.vector_store %arg5[%c0_26, %c0_27], %91 {strides = array<i32>} : memref<16x32xf32, #tpu.memory_space<vmem>>, vector<16x32xf32>,
    return
  }
  func.func @transform_0(%arg0: i32) -> (i32, i32) {
    %c0_i32 = arith.constant 0 : i32
    %c0_i32_0 = arith.constant 0 : i32
    %c0_i32_1 = arith.constant 0 : i32
    return %c0_i32, %c0_i32_0 : i32, i32
  }
  func.func @transform_1(%arg0: i32) -> (i32, i32) {
    %c0_i32 = arith.constant 0 : i32
    %c0_i32_0 = arith.constant 0 : i32
    %c0_i32_1 = arith.constant 0 : i32
    return %c0_i32, %c0_i32_0 : i32, i32
  }
  func.func @transform_2(%arg0: i32) -> (i32, i32) {
    %c0_i32 = arith.constant 0 : i32
    %c0_i32_0 = arith.constant 0 : i32
    %c0_i32_1 = arith.constant 0 : i32
    return %c0_i32, %c0_i32_0 : i32, i32
  }
  func.func @transform_3(%arg0: i32) -> (i32, i32) {
    %c0_i32 = arith.constant 0 : i32
    %c0_i32_0 = arith.constant 0 : i32
    %c0_i32_1 = arith.constant 0 : i32
    return %c0_i32, %c0_i32_0 : i32, i32
  }
  func.func @transform_4(%arg0: i32) -> (i32, i32) {
    %c0_i32 = arith.constant 0 : i32
    %c0_i32_0 = arith.constant 0 : i32
    %c0_i32_1 = arith.constant 0 : i32
    return %c0_i32, %c0_i32_0 : i32, i32
  }
}

</mosaic_0001>

<bundles_post_ra>
// kernel: tpu_custom_call.1
= control target key start
LH: loop header
LB: loop body
LE: loop exit
PB: predicated region body
PF: predicated region fallthrough
CT: control target
= control target key end

     0   :  { %9 = vsyncpa [#allocation3], 0  ;;  %s1046_s0 = inlined_call_operand.hbm [shape: f32[16,32], index: 0, kind: input, shape index: {}]   ;;  %s1047_s1 = inlined_call_operand.hbm [shape: f32[32,96], index: 1, kind: input, shape index: {}]   ;;  %s1048_s2 = inlined_call_operand.hbm [shape: f32[32,32], index: 2, kind: input, shape index: {}]   ;;  %s1049_s3 = inlined_call_operand.vmem [shape: f32[1,32], index: 3, kind: input, shape index: {}]   ;;  %s1050_s4 = inlined_call_operand.hbm [shape: f32[16,32], index: 4, kind: output, shape index: {}]  }
   0x1   :  { %10 = vsyncpa [#allocation6], 0 }
   0x2   :  { %11 = vsyncpa [#allocation4], 0  ;;  %s29_s17 = sshll.u32 %s1047_s1, 4  ;;  %s894_s18 = smov [#allocation5]   ;;  %s30_s17 = int_to_ptr.hbm [resolvable:$true] %s29_s17 }
   0x3   :  { %s31_s19 = sshll.u32 %s894_s18, 4  ;;  %s16_s22 = sshll.u32 %s1046_s0, 4  ;;  %s32_s19 = int_to_ptr.vmem [resolvable:$true] %s31_s19  ;;  %s17_s22 = int_to_ptr.hbm [resolvable:$true] %s16_s22 }
   0x4   :  { %s895_s23 = smov 128   ;;  %s896_s24 = smov 8  }
   0x5   :  { %37 = dma.hbm_to_vmem [thread:$0]  %s30_s17, 512, %s32_s19, [#allocation6], %s895_s23, %s895_s23, %s896_s24  }
   0x6   :  { %s897_s25 = smov [#allocation2]   ;;  %s42_s1 = sshll.u32 %s1048_s2, 4  ;;  %s43_s1 = int_to_ptr.hbm [resolvable:$true] %s42_s1 }
   0x7   :  { %s18_s26 = sshll.u32 %s897_s25, 4  ;;  %s898_s0 = smov [#allocation7]   ;;  %s19_s26 = int_to_ptr.vmem [resolvable:$true] %s18_s26 }
   0x8   :  { %24 = dma.hbm_to_vmem [thread:$0]  %s17_s22, 256, %s19_s26, [#allocation3], %s895_s23, %s895_s23, %s896_s24  }
   0x9   :  { %s44_s29 = sshll.u32 %s898_s0, 4  ;;  %s45_s29 = int_to_ptr.vmem [resolvable:$true] %s44_s29 }
   0xa   :  { %50 = dma.hbm_to_vmem [thread:$0]  %s43_s1, 512, %s45_s29, [#allocation6], %s895_s23, %s895_s23, %s896_s24  }
   0xb   :  { %888 = dma.done.wait [#allocation3], 256  }
   0xc   :  { %889 = vsyncadd [#allocation3], 4294967040 }
   0xd   :  { %890 = dma.done.wait [#allocation6], 1024  }
   0xe   :  { %891 = vsyncadd [#allocation6], 4294966272  ;;  %v70_v0 = vld [vmem:[#allocation5 + $0x18] sm:$0xff]  ;;  %v69_v1 = vld [vmem:[#allocation5 + $0x10] sm:$0xff]  ;;  %vm71_vm0 = vcmask 261120   ;;  %s899_s2 = smov 88   ;;  %v101_v28 = vlaneseq }
   0xf   :  { %90 = vmatpush.msra.mxu0 %v70_v0  ;;  %v68_v2 = vld [vmem:[#allocation5 + $0x8] sm:$0xff]  ;;  %v67_v3 = vld [vmem:[#allocation5] sm:$0xff]  ;;  %v65_v4 = vld [vmem:[#allocation2] sm:$0xff]  ;;  %s900_s30 = smov 96   ;;  %s901_s5 = smov 80   ;;  %vm110_vm1 = vcmask 64512  }
  0x10   :  { %v66_v5 = vld [vmem:[#allocation2 + $0x8] sm:$0xff]  ;;  %s902_s6 = smov 72   ;;  %s903_s7 = smov 120   ;;  %v102_v29 = vshrl.u32 %v101_v28, 7  ;;  %v104_v30 = vand.u32 127, %v101_v28  ;;  %vm636_vm3 = vcmask 130048  }
  0x11   :  { %91 = vmatpush.msra.mxu0 %v69_v1  ;;  %s904_s8 = smov 112   ;;  %s905_s9 = smov 104   ;;  %v908_v31 = vmov -1e+30   ;;  %vm639_vm4 = vcmask 195584  }
  0x12   :  { %s906_s10 = smov 56   ;;  %s907_s11 = smov 64   ;;  %vm105_vm2 = vcmp.le.s32.totalorder %v104_v30, %v102_v29 }
  0x13   :  { %92 = vmatpush.msra.mxu0 %v68_v2  ;;  %v106_v32 = vsel %vm105_vm2, 0.0, %v908_v31  ;;  %s909_s12 = smov 40   ;;  %s910_s13 = smov 48  }
  0x14   :  { %s911_s14 = smov 16   ;;  %s912_s15 = smov 24  }
  0x15   :  { %93 = vmatpush.msra.mxu0 %v67_v3  ;;  %s913_s18 = smov [#allocation8]   ;;  %s687_s22 = sshll.u32 %s1050_s4, 4  ;;  %s688_s22 = int_to_ptr.hbm [resolvable:$true] %s687_s22 }
  0x16   :  { %701 = vmatmul.msk.f32.vlgmr.msra.gmra.mxu0 %vm71_vm0, %v65_v4  ;;  %s685_s19 = sshll.u32 %s913_s18, 4  ;;  %s686_s19 = int_to_ptr.vmem [resolvable:$true] %s685_s19 }
  0x1e   :  { %702 = vmatmul.msk.f32.gmra.mxu0 %vm71_vm0, %v66_v5 }
  0x93   :  { %v959_v6 = vpop.f32.mrf.mxu0 }
  0x94   :  { %234 = vrot.lane.b32.xlu2 %v959_v6, %s899_s2  ;;  %108 = vrot.lane.b32.xlu0 %v959_v6, %s900_s30 }
  0x9b   :  { %v963_v7 = vpop.f32.mrf.mxu0 }
  0x9c   :  { %360 = vrot.lane.b32.xlu2 %v959_v6, %s901_s5  ;;  %262 = vrot.lane.b32.xlu1 %v963_v7, %s899_s2  ;;  %v754_v8 = vpack.i.bf16 %v963_v7, %v959_v6 }
  0x9d   :  { %136 = vrot.lane.b32.xlu0 %v963_v7, %s900_s30 }
  0xa4   :  { %486 = vrot.lane.b32.xlu2 %v959_v6, %s902_s6  ;;  %260 = vrot.lane.b32.xlu1 %v963_v7, %s903_s7 }
  0xa5   :  { %232 = vrot.lane.b32.xlu0 %v959_v6, %s903_s7 }
  0xac   :  { %386 = vrot.lane.b32.xlu2 %v963_v7, %s904_s8  ;;  %358 = vrot.lane.b32.xlu1 %v959_v6, %s904_s8 }
  0xad   :  { %484 = vrot.lane.b32.xlu0 %v959_v6, %s905_s9 }
  0xb4   :  { %755 = vrot.lane.b32.xlu2 %v754_v8, %s906_s10  ;;  %388 = vrot.lane.b32.xlu1 %v963_v7, %s901_s5 }
  0xb5   :  { %514 = vrot.lane.b32.xlu0 %v963_v7, %s902_s6 }
  0xbc   :  { %512 = vrot.lane.b32.xlu1 %v963_v7, %s905_s9 }
  0xc4   :  { %750 = vrot.lane.b32.xlu1 %v754_v8, %s907_s11 }
  0xee   :  { %v235_v9 = vpop.permute.xlu2 %234 }
  0xf6   :  { %v361_v10 = vpop.permute.xlu2 %360 }
  0xfe   :  { %v487_v11 = vpop.permute.xlu2 %486 }
 0x106   :  { %v109_v12 = vpop.permute.xlu0 %108  ;;  %v387_v13 = vpop.permute.xlu2 %386 }
 0x107   :  { %703 = vmatpush.xpose.msk.msra.mxu1 %vm110_vm1, %v109_v12 }
 0x10a   :  { %704 = vmatmul.msk.f32.vlgmr.msra.gmra.mxu1 %vm110_vm1, %v959_v6 }
 0x10b   :  { %709 = vmatpush.xpose.msk.msrb.mxu1 %vm110_vm1, %v235_v9 }
 0x10e   :  { %v983_v14 = vpop.permute.xlu2 %755  ;;  %v263_v15 = vpop.permute.xlu1 %262 }
 0x10f   :  { %v758_v16 = vunpack.i.h.bf16 %v983_v14  ;;  %v137_v17 = vpop.permute.xlu0 %136  ;;  %711 = vmatpush.xpose.msk.msra.mxu2 %vm110_vm1, %v263_v15 }
 0x110   :  { %705 = vmatpush.xpose.msk.msrb.mxu0 %vm110_vm1, %v137_v17 }
 0x111   :  { %353 = vmatpush.msra.mxu1 %v758_v16 }
 0x113   :  { %715 = vmatpush.xpose.msk.msrb.mxu2 %vm110_vm1, %v361_v10  ;;  %706 = vmatmul.msk.f32.vlgmr.msrb.gmra.mxu0 %vm110_vm1, %v963_v7 }
 0x116   :  { %v261_v18 = vpop.permute.xlu1 %260 }
 0x117   :  { %v233_v19 = vpop.permute.xlu0 %232  ;;  %712 = vmatmul.msk.f32.vlgmr.msra.gmra.mxu2 %vm110_vm1, %v261_v18 }
 0x118   :  { %710 = vmatmul.msk.f32.vlgmr.msrb.gmra.mxu1 %vm110_vm1, %v233_v19  ;;  %721 = vmatpush.xpose.msk.msra.mxu2 %vm110_vm1, %v487_v11 }
 0x11e   :  { %v359_v20 = vpop.permute.xlu1 %358 }
 0x11f   :  { %v485_v21 = vpop.permute.xlu0 %484  ;;  %716 = vmatmul.msk.f32.vlgmr.msrb.gmra.mxu2 %vm110_vm1, %v359_v20 }
 0x126   :  { %v389_v22 = vpop.permute.xlu1 %388 }
 0x127   :  { %v515_v23 = vpop.permute.xlu0 %514  ;;  %717 = vmatpush.xpose.msk.msra.mxu0 %vm110_vm1, %v389_v22  ;;  %722 = vmatmul.msk.f32.vlgmr.msra.gmra.mxu2 %vm110_vm1, %v485_v21  ;;  %v757_v22 = vunpack.i.l.bf16 %v983_v14 }
 0x12a   :  { %718 = vmatmul.msk.f32.vlgmr.msra.gmra.mxu0 %vm110_vm1, %v387_v13 }
 0x12b   :  { %723 = vmatpush.xpose.msk.msrb.mxu0 %vm110_vm1, %v515_v23 }
 0x12e   :  { %v513_v24 = vpop.permute.xlu1 %512 }
 0x132   :  { %724 = vmatmul.msk.f32.vlgmr.msrb.gmra.mxu0 %vm110_vm1, %v513_v24 }
 0x136   :  { %v751_v25 = vpop.permute.xlu1 %750 }
 0x137   :  { %v752_v26 = vunpack.i.l.bf16 %v751_v25  ;;  %v753_v27 = vunpack.i.h.bf16 %v751_v25 }
 0x139   :  { %201 = vmatpush.msra.mxu3 %v752_v26 }
 0x13b   :  { %227 = vmatpush.msrb.mxu3 %v753_v27 }
 0x187   :  { %v132_v33 = vpop.f32.mrf.mxu1 }
 0x188   :  { %v162_v34 = vmul.f32 0.17677669, %v132_v33 }
 0x18a   :  { %v164_v35 = vadd.f32 %v162_v34, %v106_v32 }
 0x18c   :  { %v166_v36 = vmul.f32 1.442695, %v164_v35 }
 0x18e   :  { %760 = vpow2.f32 %v166_v36 }
 0x190   :  { %v159_v37 = vpop.f32.mrf.mxu0 }
 0x191   :  { %v163_v38 = vmul.f32 0.17677669, %v159_v37 }
 0x193   :  { %v165_v39 = vadd.f32 %v163_v38, %v106_v32 }
 0x194   :  { %v1000_v40 = vpop.eup %760 }
 0x195   :  { %v168_v41 = vmul.f32 1.442695, %v165_v39  ;;  %v257_v42 = vpop.f32.mrf.mxu1  ;;  %v170_v43 = vsel %vm110_vm1, %v1000_v40, 0.0 }
 0x196   :  { %v288_v44 = vmul.f32 0.17677669, %v257_v42  ;;  %171 = vadd.xlane.f32.xlu2 %v170_v43 }
 0x197   :  { %762 = vpow2.f32 %v168_v41 }
 0x198   :  { %v290_v45 = vadd.f32 %v288_v44, %v106_v32 }
 0x19a   :  { %v292_v46 = vmul.f32 1.442695, %v290_v45  ;;  %v285_v47 = vpop.f32.mrf.mxu2 }
 0x19b   :  { %v289_v48 = vmul.f32 0.17677669, %v285_v47 }
 0x19c   :  { %764 = vpow2.f32 %v292_v46 }
 0x19d   :  { %v763_v49 = vpop.eup %762  ;;  %v291_v50 = vadd.f32 %v289_v48, %v106_v32 }
 0x19e   :  { %v173_v51 = vsel %vm110_vm1, %v763_v49, 0.0 }
 0x19f   :  { %v294_v52 = vmul.f32 1.442695, %v291_v50  ;;  %174 = vadd.xlane.f32.xlu0 %v173_v51 }
 0x1a1   :  { %766 = vpow2.f32 %v294_v52 }
 0x1a2   :  { %v765_v53 = vpop.eup %764  ;;  %v383_v54 = vpop.f32.mrf.mxu2 }
 0x1a3   :  { %v296_v55 = vsel %vm110_vm1, %v765_v53, 0.0  ;;  %v414_v12 = vmul.f32 0.17677669, %v383_v54  ;;  %v645_v54 = vld [vmem:[#allocation7 + $0x18] sm:$0xff] }
 0x1a4   :  { %297 = vadd.xlane.f32.xlu1 %v296_v55  ;;  %v644_v55 = vld [vmem:[#allocation7 + $0x10] sm:$0xff]  ;;  %668 = vmatpush.msrb.mxu2 %v645_v54 }
 0x1a5   :  { %v416_v15 = vadd.f32 %v414_v12, %v106_v32 }
 0x1a6   :  { %669 = vmatpush.msrb.mxu2 %v644_v55 }
 0x1a7   :  { %v767_v56 = vpop.eup %766  ;;  %v411_v57 = vpop.f32.mrf.mxu0  ;;  %v418_v17 = vmul.f32 1.442695, %v416_v15 }
 0x1a8   :  { %v415_v58 = vmul.f32 0.17677669, %v411_v57  ;;  %v299_v59 = vsel %vm110_vm1, %v767_v56, 0.0  ;;  %v642_v57 = vld [vmem:[#allocation7] sm:$0xff] }
 0x1a9   :  { %300 = vadd.xlane.f32.xlu0 %v299_v59 }
 0x1aa   :  { %v417_v60 = vadd.f32 %v415_v58, %v106_v32  ;;  %v509_v62 = vpop.f32.mrf.mxu2 }
 0x1ab   :  { %v540_v0 = vmul.f32 0.17677669, %v509_v62 }
 0x1ac   :  { %v420_v61 = vmul.f32 1.442695, %v417_v60 }
 0x1ad   :  { %v542_v4 = vadd.f32 %v540_v0, %v106_v32 }
 0x1ae   :  { %768 = vpow2.f32 %v420_v61  ;;  %558 = vrot.lane.b32.xlu2 %v959_v6, %s909_s12 }
 0x1af   :  { %v537_v63 = vpop.f32.mrf.mxu0  ;;  %v544_v9 = vmul.f32 1.442695, %v542_v4 }
 0x1b0   :  { %v541_v1 = vmul.f32 0.17677669, %v537_v63 }
 0x1b2   :  { %v543_v2 = vadd.f32 %v541_v1, %v106_v32 }
 0x1b4   :  { %v769_v3 = vpop.eup %768  ;;  %v546_v5 = vmul.f32 1.442695, %v543_v2 }
 0x1b5   :  { %v425_v8 = vsel %vm110_vm1, %v769_v3, 0.0 }
 0x1b6   :  { %770 = vpow2.f32 %v546_v5  ;;  %426 = vadd.xlane.f32.xlu0 %v425_v8  ;;  %v759_v8 = vld [vmem:[%s1049_s3] ss:$0 sm:$0xff] }
 0x1b7   :  { %772 = vpow2.f32 %v544_v9 }
 0x1b8   :  { %774 = vpow2.f32 %v418_v17 }
 0x1bc   :  { %v1009_v10 = vpop.eup %770 }
 0x1bd   :  { %432 = vrot.lane.b32.xlu1 %v959_v6, %s910_s13  ;;  %v551_v11 = vsel %vm110_vm1, %v1009_v10, 0.0  ;;  %v773_v13 = vpop.eup %772 }
 0x1be   :  { %552 = vadd.xlane.f32.xlu0 %v551_v11  ;;  %v548_v16 = vsel %vm110_vm1, %v773_v13, 0.0  ;;  %v775_v18 = vpop.eup %774 }
 0x1bf   :  { %v422_v19 = vsel %vm110_vm1, %v775_v18, 0.0 }
 0x1c6   :  { %549 = vadd.xlane.f32.xlu0 %v548_v16 }
 0x1d7   :  { %423 = vadd.xlane.f32.xlu2 %v422_v19 }
 0x1da   :  { %584 = vrot.lane.b32.xlu0 %v963_v7, %s909_s12 }
 0x1ef   :  { %458 = vrot.lane.b32.xlu2 %v963_v7, %s910_s13 }
 0x209   :  { %v172_v6 = vpop.xlane.xlu2 %171 }
 0x20a   :  { %776 = vrcp.f32 %v172_v6 }
 0x210   :  { %v777_v20 = vpop.eup %776 }
 0x211   :  { %v178_v21 = vmul.f32 %v777_v20, %v1000_v40  ;;  %v559_v31 = vpop.permute.xlu2 %558 }
 0x212   :  { %v175_v23 = vpop.xlane.xlu0 %174 }
 0x213   :  { %778 = vrcp.f32 %v175_v23  ;;  %707 = vmatmul.msk.f32.vlgmr.msra.gmra.mxu3 %vm110_vm1, %v178_v21 }
 0x214   :  { %327 = vmatpush.msra.mxu3 %v757_v22 }
 0x217   :  { %v298_v24 = vpop.xlane.xlu1 %297 }
 0x218   :  { %780 = vrcp.f32 %v298_v24 }
 0x219   :  { %v779_v25 = vpop.eup %778 }
 0x21a   :  { %v179_v26 = vmul.f32 %v779_v25, %v763_v49 }
 0x21c   :  { %708 = vmatmul.msk.f32.vlgmr.msrb.gmra.mxu3 %vm110_vm1, %v179_v26  ;;  %v301_v27 = vpop.xlane.xlu0 %300 }
 0x21d   :  { %782 = vrcp.f32 %v301_v27 }
 0x21e   :  { %v781_v7 = vpop.eup %780 }
 0x21f   :  { %v304_v28 = vmul.f32 %v781_v7, %v765_v53 }
 0x223   :  { %v783_v29 = vpop.eup %782 }
 0x224   :  { %v305_v30 = vmul.f32 %v783_v29, %v767_v56  ;;  %713 = vmatmul.msk.f32.vlgmr.msra.gmra.mxu3 %vm110_vm1, %v304_v28  ;;  %v643_v56 = vld [vmem:[#allocation7 + $0x8] sm:$0xff] }
 0x225   :  { %670 = vmatpush.msrb.mxu2 %v643_v56 }
 0x226   :  { %714 = vmatmul.msk.f32.vlgmr.msra.gmra.mxu1 %vm110_vm1, %v305_v30 }
 0x227   :  { %671 = vmatpush.msrb.mxu2 %v642_v57 }
 0x229   :  { %v427_v32 = vpop.xlane.xlu0 %426 }
 0x22a   :  { %784 = vrcp.f32 %v427_v32 }
 0x22f   :  { %v433_v14 = vpop.permute.xlu1 %432 }
 0x230   :  { %453 = vmatpush.msrb.mxu3 %v433_v14  ;;  %v785_v36 = vpop.eup %784 }
 0x231   :  { %v553_v33 = vpop.xlane.xlu0 %552  ;;  %v431_v38 = vmul.f32 %v785_v36, %v769_v3 }
 0x232   :  { %579 = vmatpush.msra.mxu3 %v559_v31 }
 0x239   :  { %v550_v35 = vpop.xlane.xlu0 %549 }
 0x24a   :  { %v424_v34 = vpop.xlane.xlu2 %423 }
 0x24b   :  { %786 = vrcp.f32 %v424_v34 }
 0x24c   :  { %788 = vrcp.f32 %v553_v33  ;;  %v585_v41 = vpop.permute.xlu0 %584 }
 0x24d   :  { %790 = vrcp.f32 %v550_v35 }
 0x251   :  { %v787_v37 = vpop.eup %786 }
 0x252   :  { %v430_v39 = vmul.f32 %v787_v37, %v775_v18  ;;  %v459_v40 = vpop.permute.xlu2 %458  ;;  %v789_v42 = vpop.eup %788 }
 0x253   :  { %479 = vmatpush.msrb.mxu1 %v459_v40  ;;  %v791_v43 = vpop.eup %790  ;;  %v557_v44 = vmul.f32 %v789_v42, %v1009_v10 }
 0x254   :  { %719 = vmatmul.msk.f32.vlgmr.msrb.gmra.mxu3 %vm110_vm1, %v430_v39  ;;  %720 = vmatmul.msk.f32.vlgmr.msrb.gmra.mxu1 %vm110_vm1, %v431_v38  ;;  %v556_v45 = vmul.f32 %v791_v43, %v773_v13 }
 0x255   :  { %605 = vmatpush.msra.mxu1 %v585_v41 }
 0x25c   :  { %725 = vmatmul.msk.f32.vlgmr.msra.gmra.mxu3 %vm110_vm1, %v556_v45  ;;  %726 = vmatmul.msk.f32.vlgmr.msra.gmra.mxu1 %vm110_vm1, %v557_v44 }
 0x296   :  { %v203_v46 = vpop.f32.mrf.mxu3 }
 0x29f   :  { %v229_v47 = vpop.f32.mrf.mxu3 }
 0x2a3   :  { %v355_v49 = vpop.f32.mrf.mxu1 }
 0x2a7   :  { %v329_v48 = vpop.f32.mrf.mxu3 }
 0x2a8   :  { %612 = vrot.lane.b32.xlu1 %v329_v48, %s896_s24 }
 0x2d1   :  { %v481_v50 = vpop.f32.mrf.mxu1 }
 0x2d7   :  { %v455_v51 = vpop.f32.mrf.mxu3 }
 0x2d8   :  { %620 = vrot.lane.b32.xlu2 %v455_v51, %s911_s14 }
 0x2d9   :  { %v607_v52 = vpop.f32.mrf.mxu1 }
 0x2da   :  { %630 = vrot.lane.b32.xlu0 %v607_v52, %s912_s15 }
 0x2df   :  { %v581_v53 = vpop.f32.mrf.mxu3 }
 0x2e0   :  { %614 = vrot.lane.b32.xlu2 %v355_v49, %s896_s24  ;;  %628 = vrot.lane.b32.xlu1 %v581_v53, %s912_s15 }
 0x2e8   :  { %622 = vrot.lane.b32.xlu1 %v481_v50, %s911_s14 }
 0x31a   :  { %v613_v58 = vpop.permute.xlu1 %612 }
 0x31b   :  { %v634_v60 = vsel %vm110_vm1, %v203_v46, %v613_v58 }
 0x332   :  { %v621_v59 = vpop.permute.xlu2 %620 }
 0x333   :  { %v637_v61 = vsel %vm636_vm3, %v634_v60, %v621_v59 }
 0x33a   :  { %v615_v0 = vpop.permute.xlu2 %614 }
 0x33b   :  { %v635_v1 = vsel %vm110_vm1, %v229_v47, %v615_v0 }
 0x34c   :  { %v631_v3 = vpop.permute.xlu0 %630 }
 0x352   :  { %v629_v62 = vpop.permute.xlu1 %628 }
 0x353   :  { %v640_v63 = vsel %vm639_vm4, %v637_v61, %v629_v62 }
 0x354   :  { %727 = vmatmul.msk.f32.vlgmr.msrb.gmra.mxu2 %vm71_vm0, %v640_v63 }
 0x35a   :  { %v623_v2 = vpop.permute.xlu1 %622 }
 0x35b   :  { %v638_v4 = vsel %vm636_vm3, %v635_v1, %v623_v2 }
 0x35c   :  { %v641_v5 = vsel %vm639_vm4, %v638_v4, %v631_v3 }
 0x35d   :  { %728 = vmatmul.msk.f32.gmra.mxu2 %vm71_vm0, %v641_v5 }
 0x3d7   :  { %v673_v9 = vpop.f32.mrf.mxu2 }
 0x3d8   :  { %v674_v10 = vadd.f32 %v759_v8, %v673_v9 }
 0x3da   :  { %679 = vst.msk [vmem:[#allocation8] sm:$0xff] %vm71_vm0, %v674_v10 }
 0x3e0   :  { %v676_v11 = vpop.f32.mrf.mxu2 }
 0x3e1   :  { %v677_v12 = vadd.f32 %v759_v8, %v676_v11 }
 0x3e3   :  { %680 = vst.msk [vmem:[#allocation8 + $0x8] sm:$0xff] %vm71_vm0, %v677_v12 }
 0x3e4   :  { %693 = dma.vmem_to_hbm [thread:$0]  %s686_s19, 256, %s688_s22, [#allocation4], %s895_s23, %s895_s23, %s896_s24  }
 0x3e5   :  { %892 = dma.done.wait [#allocation4], 256  }
 0x3e6   :  { %893 = vsyncadd [#allocation4], 4294967040 }
 0x3e7   :  { %698 = vsyncpa [#allocation3], 1 }
 0x3e8   :  { %699 = vsyncpa [#allocation6], 1 }
 0x3e9   :  { %700 = vsyncpa [#allocation4], 1 }

</bundles_post_ra>
